<compile_context>
chip_gen: v6e
topology: v6e:2x2x1
jax: 0.10.0
libtpu: 0.0.40
codegen_flags: <defaults>
</compile_context>

<pallas_src>
import functools

import jax
import jax.numpy as jnp
from jax import lax
from jax.experimental import pallas as pl
from jax.experimental.pallas import tpu as pltpu


# ---------------------------------------------------------------------------
# Kernel
# ---------------------------------------------------------------------------

def _sundry_kernel(bb, mid, cx,
                   xy_ref,   # (bb, Cx+Cy+1, HW) f32   : [x ; y ; ones]
                   wp_ref,   # (3*mid+1, Cx+Cy+1) bf16 : fused projections (+biases, +ones row)
                   wu_ref,   # (Cx, mid+1) bf16        : [Wu | bu]
                   o_ref):   # (bb, Cx, HW) f32
    wp = wp_ref[...]
    wu = wu_ref[...]

    # Static, short loop over the batch elements inside the block (bb is 1-2
    # here; for large bb prefer lax.fori_loop(unroll=True)).
    for b in range(bb):
        xy = xy_ref[b]                                   # (Cin_aug, HW) f32
        xyb = xy.astype(jnp.bfloat16)

        # One fused MXU push for f_x, f_y, f_self and all their biases
        # (biases enter via the ones channel of xy).
        h = jnp.dot(wp, xyb, preferred_element_type=jnp.float32)  # (3*mid+1, HW)
        fx = h[0:mid]                 # f_x rows (scale already folded in)
        fy = h[mid:2 * mid]           # f_y rows
        fs = h[2 * mid:3 * mid + 1]   # f_self rows + an exact all-ones row

        # sim[i, j] = sum_m fx[m, i] * fy[m, j]   (TN contraction; only the
        # small (mid,HW) operand could ever need a relayout).
        sim = lax.dot_general(fx.astype(jnp.bfloat16), fy.astype(jnp.bfloat16),
                              (((0,), (0,)), ((), ())),
                              preferred_element_type=jnp.float32)   # (HW, HW)

        # Un-normalized softmax numerator (f32 math, EUP exp).
        p = jnp.exp(sim - jnp.max(sim, axis=-1, keepdims=True))
        pb = p.astype(jnp.bfloat16)

        # fo[m, i] = sum_j fs[m, j] * p[i, j]  (NT, same dimension_numbers as
        # flash-attention q@k^T).  Row `mid` of fo is the softmax denominator,
        # already in (1, HW) lane layout thanks to the ones row of fs.
        fo = lax.dot_general(fs.astype(jnp.bfloat16), pb,
                             (((1,), (1,)), ((), ())),
                             preferred_element_type=jnp.float32)    # (mid+1, HW)

        inv = pl.reciprocal(fo[mid:mid + 1, :], approx=True)        # (1, HW)
        fo_n = (fo * inv).astype(jnp.bfloat16)   # rows 0..mid-1 normalized, row mid ~ 1

        # f_up (conv+BN folded, bias via the ~1 row) + residual.
        up = jnp.dot(wu, fo_n, preferred_element_type=jnp.float32)  # (Cx, HW)
        o_ref[b] = xy[0:cx] + up


def sundry_pallas(x_nchw, y_nchw, w_proj, w_up, *, mid_channels, batch_block=1):
    """x: (B,Cx,H,W) f32, y: (B,Cy,H,W) f32; w_proj/w_up from _pack_kernel_params."""
    B, Cx, H, W = x_nchw.shape
    Cy = y_nchw.shape[1]
    HW = H * W
    assert B % batch_block == 0, "batch_block must divide B"
    cin_aug = Cx + Cy + 1

    # Free reshapes + one small concat: fused activation operand [x ; y ; ones].
    xy = jnp.concatenate(
        [x_nchw.reshape(B, Cx, HW),
         y_nchw.reshape(B, Cy, HW),
         jnp.ones((B, 1, HW), x_nchw.dtype)], axis=1)               # (B, Cin_aug, HW)

    kernel = functools.partial(_sundry_kernel, batch_block, mid_channels, Cx)

    out_flat = pl.pallas_call(
        kernel,
        out_shape=jax.ShapeDtypeStruct((B, Cx, HW), jnp.float32),
        grid_spec=pltpu.PrefetchScalarGridSpec(
            num_scalar_prefetch=0,
            grid=(B // batch_block,),
            in_specs=[
                pl.BlockSpec((batch_block, cin_aug, HW), lambda b: (b, 0, 0)),
                pl.BlockSpec(w_proj.shape, lambda b: (0, 0)),
                pl.BlockSpec(w_up.shape, lambda b: (0, 0)),
            ],
            out_specs=pl.BlockSpec((batch_block, Cx, HW), lambda b: (b, 0, 0)),
        ),
        compiler_params=pltpu.CompilerParams(
            dimension_semantics=("parallel",)),
    )(xy, w_proj, w_up)

    return out_flat.reshape(B, Cx, H, W)


# ---------------------------------------------------------------------------
# Parameter construction & folding
# ---------------------------------------------------------------------------

def _make_raw_params(key, xin, yin, mid):
    """Raw conv/BN tensors for the 7 (Conv1x1, BN) pairs of the module."""
    ks = jax.random.split(key, 35)       # 7 pairs x 5 tensors each
    it = iter(ks)

    def conv_bn(cout, cin):
        w = 0.2 * jax.random.normal(next(it), (cout, cin), jnp.float32)
        gamma = 1.0 + 0.1 * jax.random.normal(next(it), (cout,), jnp.float32)
        beta = 0.1 * jax.random.normal(next(it), (cout,), jnp.float32)
        mean = 0.1 * jax.random.normal(next(it), (cout,), jnp.float32)
        var = 0.5 + jnp.abs(jax.random.normal(next(it), (cout,), jnp.float32))
        return dict(w=w, gamma=gamma, beta=beta, mean=mean, var=var)

    return dict(
        self_a=conv_bn(mid, xin), self_b=conv_bn(mid, mid),
        x_a=conv_bn(mid, xin),    x_b=conv_bn(mid, mid),
        y_a=conv_bn(mid, yin),    y_b=conv_bn(mid, mid),
        up=conv_bn(xin, mid),
    )


def _fold_conv_bn(p, eps=1e-5):
    """1x1 no-bias conv + eval-mode BN -> affine (W (Cout,Cin), b (Cout,))."""
    s = p["gamma"] / jnp.sqrt(p["var"] + eps)
    return p["w"] * s[:, None], p["beta"] - p["mean"] * s


def _fold_two_layers(pa, pb):
    """Compose two conv+BN affine maps (no nonlinearity in between)."""
    W1, b1 = _fold_conv_bn(pa)
    W2, b2 = _fold_conv_bn(pb)
    return W2 @ W1, W2 @ b1 + b2


def _pack_kernel_params(raw, *, mid, cx, cy, scale):
    """Pack everything into two bf16 operands:
       w_proj (3*mid+1, cx+cy+1): rows [fx | fy | fself | ones-row], last column
         holds every branch bias (consumed by the ones input channel); the
         optional mid^-0.5 scale is pre-multiplied into the fx rows.
       w_up (cx, mid+1): [Wu | bu] — bu multiplies the ~1 denominator row.
       (This folds ALL biases exactly; n.b. only f_y's bias would cancel under
        the softmax, so selective dropping is unnecessary and riskier.)"""
    Ws, bs = _fold_two_layers(raw["self_a"], raw["self_b"])   # (mid,cx),(mid,)
    Wx, bx = _fold_two_layers(raw["x_a"], raw["x_b"])         # (mid,cx),(mid,)
    Wy, by = _fold_two_layers(raw["y_a"], raw["y_b"])         # (mid,cy),(mid,)
    Wu, bu = _fold_conv_bn(raw["up"])                         # (cx,mid),(cx,)

    if scale:
        sc = mid ** -0.5
        Wx = Wx * sc
        bx = bx * sc

    cin = cx + cy + 1
    wp = jnp.zeros((3 * mid + 1, cin), jnp.float32)
    wp = wp.at[0:mid, 0:cx].set(Wx)
    wp = wp.at[0:mid, cin - 1].set(bx)
    wp = wp.at[mid:2 * mid, cx:cx + cy].set(Wy)
    wp = wp.at[mid:2 * mid, cin - 1].set(by)
    wp = wp.at[2 * mid:3 * mid, 0:cx].set(Ws)
    wp = wp.at[2 * mid:3 * mid, cin - 1].set(bs)
    wp = wp.at[3 * mid, cin - 1].set(1.0)            # exact ones output row

    wu = jnp.concatenate([Wu, bu[:, None]], axis=1)  # (cx, mid+1)
    return wp.astype(jnp.bfloat16), wu.astype(jnp.bfloat16)


# ---------------------------------------------------------------------------
# Pure-JAX reference reproducing the PyTorch forward (eval-mode BN, unfused)
# ---------------------------------------------------------------------------

def _reference(x, y, raw, *, mid_channels, scale=False):
    def conv_bn(inp, p, eps=1e-5):
        out = jnp.einsum("oc,bchw->bohw", p["w"], inp)
        s = p["gamma"] / jnp.sqrt(p["var"] + eps)
        return out * s[None, :, None, None] + (p["beta"] - p["mean"] * s)[None, :, None, None]

    B, Cx, H, W = x.shape
    fself = conv_bn(conv_bn(x, raw["self_a"]), raw["self_b"]).reshape(B, mid_channels, -1)
    fx = conv_bn(conv_bn(x, raw["x_a"]), raw["x_b"]).reshape(B, mid_channels, -1)
    fy = conv_bn(conv_bn(y, raw["y_a"]), raw["y_b"]).reshape(B, mid_channels, -1)
    fself_t = jnp.transpose(fself, (0, 2, 1))           # (B, HW, mid)
    fx_t = jnp.transpose(fx, (0, 2, 1))                 # (B, HW, mid)
    sim = jnp.einsum("bim,bmj->bij", fx_t, fy)          # (B, HW, HW)
    if scale:
        sim = sim * (mid_channels ** -0.5)
    attn = jax.nn.softmax(sim, axis=-1)
    fout = jnp.einsum("bij,bjm->bim", attn, fself_t)    # (B, HW, mid)
    fout = jnp.transpose(fout, (0, 2, 1)).reshape(B, mid_channels, H, W)
    up = conv_bn(fout, raw["up"])
    return x + up


# ---------------------------------------------------------------------------
# Main
# ---------------------------------------------------------------------------

if __name__ == "__main__":
    B, XIN, YIN, MID, H, W = 2, 8, 12, 16, 16, 16   # HW = 256 -> lane-dense tiles
    SCALE = True

    key = jax.random.PRNGKey(0)
    kx, ky, kp = jax.random.split(key, 3)
    x = jax.random.normal(kx, (B, XIN, H, W), jnp.float32)   # NCHW, like PyTorch
    y = jax.random.normal(ky, (B, YIN, H, W), jnp.float32)

    raw = _make_raw_params(kp, XIN, YIN, MID)
    w_proj, w_up = _pack_kernel_params(raw, mid=MID, cx=XIN, cy=YIN, scale=SCALE)

    ref = _reference(x, y, raw, mid_channels=MID, scale=SCALE)

    # batch_block=1: >=2 parallel grid blocks (v7x megacore friendly).
    out1 = jax.block_until_ready(
        sundry_pallas(x, y, w_proj, w_up, mid_channels=MID, batch_block=1))
    # batch_block=2: single grid step, amortizes per-step overhead (v5e/v6e).
    out2 = jax.block_until_ready(
        sundry_pallas(x, y, w_proj, w_up, mid_channels=MID, batch_block=2))

    assert out1.shape == (B, XIN, H, W)
    assert out2.shape == (B, XIN, H, W)
    # bf16 MXU operands (weights, p, folded biases) vs f32 reference.
    assert jnp.allclose(out1, ref, atol=2.5e-2, rtol=2.5e-2), "mismatch vs reference (bb=1)"
    assert jnp.allclose(out2, ref, atol=2.5e-2, rtol=2.5e-2), "mismatch vs reference (bb=2)"

    print("KERNEL_OK")
</pallas_src>

<mosaic_0001>
module attributes {stable_mosaic.version = 11 : i64} {
  func.func @_sundry_kernel(%arg0: i32, %arg1: memref<1x21x256xf32, #tpu.memory_space<vmem>>, %arg2: memref<49x21xbf16, #tpu.memory_space<vmem>>, %arg3: memref<8x17xbf16, #tpu.memory_space<vmem>>, %arg4: memref<1x8x256xf32, #tpu.memory_space<vmem>>) attributes {dimension_semantics = [#tpu.dimension_semantics<parallel>], iteration_bounds = array<i64: 2>, scalar_prefetch = 0 : i64, scratch_operands = 0 : i64, tpu.core_type = #tpu.core_type<tc>, window_params = [{transform_indices = @transform_0, window_bounds = array<i64: 1, 21, 256>}, {pipeline_mode = #tpu.pipeline_mode<synchronous>, transform_indices = @transform_1, window_bounds = array<i64: 49, 21>}, {pipeline_mode = #tpu.pipeline_mode<synchronous>, transform_indices = @transform_2, window_bounds = array<i64: 8, 17>}, {transform_indices = @transform_3, window_bounds = array<i64: 1, 8, 256>}]} {
    %c0 = arith.constant 0 : index
    %c0_0 = arith.constant 0 : index
    %0 = vector.load %arg2[%c0, %c0_0] : memref<49x21xbf16, #tpu.memory_space<vmem>>, vector<49x21xbf16>
    %c0_1 = arith.constant 0 : index
    %c0_2 = arith.constant 0 : index
    %1 = vector.load %arg3[%c0_1, %c0_2] : memref<8x17xbf16, #tpu.memory_space<vmem>>, vector<8x17xbf16>
    %c0_3 = arith.constant 0 : index
    %c0_4 = arith.constant 0 : index
    %c0_5 = arith.constant 0 : index
    %2 = vector.load %arg1[%c0_3, %c0_4, %c0_5] : memref<1x21x256xf32, #tpu.memory_space<vmem>>, vector<1x21x256xf32>
    %3 = vector.shape_cast %2 : vector<1x21x256xf32> to vector<21x256xf32>
    %4 = arith.truncf %3 : vector<21x256xf32> to vector<21x256xbf16>
    %cst = arith.constant dense<0.000000e+00> : vector<49x256xf32>
    %5 = tpu.matmul %0, %4, %cst {dimension_numbers = #tpu.dot_dimension_numbers<[1], [0], [0], [1], [0, 0, 1, 1], [], []>} : vector<49x21xbf16>, vector<21x256xbf16>, vector<49x256xf32> -> vector<49x256xf32>
    %6 = vector.extract_strided_slice %5 {offsets = [0, 0], sizes = [16, 256], strides = [1, 1]} : vector<49x256xf32> to vector<16x256xf32>
    %7 = vector.extract_strided_slice %5 {offsets = [16, 0], sizes = [16, 256], strides = [1, 1]} : vector<49x256xf32> to vector<16x256xf32>
    %8 = vector.extract_strided_slice %5 {offsets = [32, 0], sizes = [17, 256], strides = [1, 1]} : vector<49x256xf32> to vector<17x256xf32>
    %9 = arith.truncf %6 : vector<16x256xf32> to vector<16x256xbf16>
    %10 = arith.truncf %7 : vector<16x256xf32> to vector<16x256xbf16>
    %cst_6 = arith.constant dense<0.000000e+00> : vector<256x256xf32>
    %11 = tpu.matmul %9, %10, %cst_6 {dimension_numbers = #tpu.dot_dimension_numbers<[0], [0], [1], [1], [0, 1, 1, 1], [], []>} : vector<16x256xbf16>, vector<16x256xbf16>, vector<256x256xf32> -> vector<256x256xf32>
    %cst_7 = arith.constant dense<0xFF800000> : vector<256xf32>
    %12 = vector.multi_reduction <maximumf>, %11, %cst_7 [1] : vector<256x256xf32> to vector<256xf32>
    %13 = vector.shape_cast %12 : vector<256xf32> to vector<256x1xf32>
    %14 = vector.broadcast %13 : vector<256x1xf32> to vector<256x256xf32>
    %15 = arith.subf %11, %14 : vector<256x256xf32>
    %16 = math.exp %15 : vector<256x256xf32>
    %17 = arith.truncf %16 : vector<256x256xf32> to vector<256x256xbf16>
    %18 = arith.truncf %8 : vector<17x256xf32> to vector<17x256xbf16>
    %cst_8 = arith.constant dense<0.000000e+00> : vector<17x256xf32>
    %19 = tpu.matmul %18, %17, %cst_8 {dimension_numbers = #tpu.dot_dimension_numbers<[1], [1], [0], [0], [0, 0, 1, 0], [], []>} : vector<17x256xbf16>, vector<256x256xbf16>, vector<17x256xf32> -> vector<17x256xf32>
    %20 = vector.extract_strided_slice %19 {offsets = [16, 0], sizes = [1, 256], strides = [1, 1]} : vector<17x256xf32> to vector<1x256xf32>
    %21 = tpu.reciprocal %20 {approx = true} : vector<1x256xf32> -> vector<1x256xf32>
    %22 = vector.broadcast %21 : vector<1x256xf32> to vector<17x256xf32>
    %23 = arith.mulf %19, %22 : vector<17x256xf32>
    %24 = arith.truncf %23 : vector<17x256xf32> to vector<17x256xbf16>
    %cst_9 = arith.constant dense<0.000000e+00> : vector<8x256xf32>
    %25 = tpu.matmul %1, %24, %cst_9 {dimension_numbers = #tpu.dot_dimension_numbers<[1], [0], [0], [1], [0, 0, 1, 1], [], []>} : vector<8x17xbf16>, vector<17x256xbf16>, vector<8x256xf32> -> vector<8x256xf32>
    %26 = vector.extract_strided_slice %3 {offsets = [0, 0], sizes = [8, 256], strides = [1, 1]} : vector<21x256xf32> to vector<8x256xf32>
    %27 = arith.addf %26, %25 : vector<8x256xf32>
    %c0_10 = arith.constant 0 : index
    %c0_11 = arith.constant 0 : index
    %c0_12 = arith.constant 0 : index
    %28 = vector.load %arg4[%c0_10, %c0_11, %c0_12] : memref<1x8x256xf32, #tpu.memory_space<vmem>>, vector<1x8x256xf32>
    %29 = vector.shape_cast %28 : vector<1x8x256xf32> to vector<8x256xf32>
    %30 = vector.shape_cast %27 : vector<8x256xf32> to vector<1x8x256xf32>
    tpu.vector_store %arg4[%c0_10, %c0_11, %c0_12], %30 {strides = array<i32>} : memref<1x8x256xf32, #tpu.memory_space<vmem>>, vector<1x8x256xf32>,
    return
  }
  func.func @transform_0(%arg0: i32) -> (i32, i32, i32) {
    %c0_i32 = arith.constant 0 : i32
    %c0_i32_0 = arith.constant 0 : i32
    %c0_i32_1 = arith.constant 0 : i32
    return %arg0, %c0_i32, %c0_i32_0 : i32, i32, i32
  }
  func.func @transform_1(%arg0: i32) -> (i32, i32) {
    %c0_i32 = arith.constant 0 : i32
    %c0_i32_0 = arith.constant 0 : i32
    %c0_i32_1 = arith.constant 0 : i32
    return %c0_i32, %c0_i32_0 : i32, i32
  }
  func.func @transform_2(%arg0: i32) -> (i32, i32) {
    %c0_i32 = arith.constant 0 : i32
    %c0_i32_0 = arith.constant 0 : i32
    %c0_i32_1 = arith.constant 0 : i32
    return %c0_i32, %c0_i32_0 : i32, i32
  }
  func.func @transform_3(%arg0: i32) -> (i32, i32, i32) {
    %c0_i32 = arith.constant 0 : i32
    %c0_i32_0 = arith.constant 0 : i32
    %c0_i32_1 = arith.constant 0 : i32
    return %arg0, %c0_i32, %c0_i32_0 : i32, i32, i32
  }
}

</mosaic_0001>

<bundles_post_ra>
// kernel: tpu_custom_call.1
= control target key start
LH: loop header
LB: loop body
LE: loop exit
PB: predicated region body
PF: predicated region fallthrough
CT: control target
= control target key end

     0   :  { %8 = vsyncpa [#allocation3], 0  ;;  %s1846_s0 = inlined_call_operand.vmem [shape: f32[2,21,256], index: 0, kind: input, shape index: {}]   ;;  %s1847_s1 = inlined_call_operand.vmem [shape: bf16[49,21], index: 1, kind: input, shape index: {}]   ;;  %s1848_s2 = inlined_call_operand.vmem [shape: bf16[8,17], index: 2, kind: input, shape index: {}]   ;;  %s1849_s3 = inlined_call_operand.hbm [shape: f32[2,8,256], index: 3, kind: output, shape index: {}]  }
   0x1   :  { %10 = vsyncpa [#allocation3 + $0x1], 0  ;;  %s1407_s12 = smov 0   ;;  %s1409_s13 = smov 0  }
   0x2   :  { %s1411_s14 = smov 0   ;;  %s1413_s15 = smov 0  }
   0x3 LB: > { %s1428_s16 = sadd.s32 4294967295, %s1382_s15   ;;  %s1105_s17 = sadd.s32 4294967294, %s1382_s15   ;;  %s1382_s15 = sphi %s1413_s15, %s1896_s15   ;;  %s1378_s14 = sphi %s1411_s14, %s1895_s14   ;;  %s1374_s13 = sphi %s1409_s13, %s1894_s13   ;;  %s1370_s12 = sphi %s1407_s12, %s1893_s12  }
   0x4   : > { %s1432_s18 = sadd.s32 1, %s1382_s15   ;;  %s91_s19 = sadd.s32 1, %s1378_s14 }
   0x5   : > { %s88_s20 = ssub.s32 %s1382_s15, %s1432_s18  ;;  %p101_p0 = scmp.ne.s32.totalorder %s1378_s14, %s1374_s13 }
   0x6   : > { %p89_p1 = scmp.eq.s32.totalorder %s88_s20, 0  ;;  %p102_p2 = scmp.eq.s32.totalorder %s1428_s16, 1 }
   0x7   : > { %p107_p3 = scmp.ne.s32.totalorder %s1374_s13, %s1370_s12  ;;  %p108_p4 = scmp.eq.s32.totalorder %s1105_s17, 1 }
   0x8   : > { %s1443_s21 = scalar_select %p89_p1, %s1378_s14, %s91_s19  }
   0x9   : > { %p1445_p5 = por %p102_p2, %p101_p0  ;;  %p1449_p6 = por %p108_p4, %p107_p3 }
   0xa   : > { %p1108_p7 = scmp.ge.s32.totalorder %s1382_s15, 1  ;;  %p140_p8 = scmp.lt.s32.totalorder %s1382_s15, 3 }
   0xc   : > { %p141_p9 = pnand %p1108_p7, %p140_p8 }
   0xe   : > { %144 = sbr.rel (%p141_p9) target bundleno = 1325 (0x52d), region = 32 }
  0x13   : > { %p164_p10 = scmp.lt.s32.totalorder %s1428_s16, 1  ;;  %vm219_vm0 = vcmask 1041408   ;;  %v1850_v0 = vmov 0   ;;  %vm220_vm1 = vcmask 1042432   ;;  %v1385_v1 = vmov 65535   ;;  %v1184_v16 = vld [vmem:[%s1847_s1] sm:$0xff]  }
  0x14   : > { %261 = vmatprep.mubr.bf16.mxu0 %v1850_v0  ;;  %417 = vmatprep.mubr.bf16.mxu1 %v1850_v0  ;;  %v221_v2 = vsel %vm219_vm0, 4294967295, %v1385_v1  ;;  %vm206_vm2 = vcmask 171008   ;;  %v1185_v17 = vld [vmem:[%s1847_s1 + $0x8] sm:$0xff]   ;;  %vm336_vm3 = vcmask 130048   ;;  %v1186_v53 = vld [vmem:[%s1847_s1 + $0x10] sm:$0xff]   ;;  %vm977_vm4 = vcmask 1040384  }
  0x15   : > { %s165_s24 = scalar_select %p164_p10, %s1428_s16, 1  ;;  %v222_v4 = vsel %vm220_vm1, %v221_v2, 0  ;;  %v1187_v60 = vld [vmem:[%s1847_s1 + $0x18] ss:$0 sps:$4 sm:$0x11]   ;;  %vm973_vm5 = vcmask 138240  }
  0x16   : > { %s161_s17 = sand.u32 1, %s1374_s13   ;;  %s1141_s20 = sshll.u32 %s1428_s16, 8 }
  0x17   : > { %s1142_s25 = smul.u32 48, %s165_s24  ;;  %s1109_s19 = sshll.u32 %s161_s17, 4 }
  0x18   : > { %s163_s24 = scalar_lea.vmem [#allocation2], %s1109_s19  ;;  %s1805_s29 = scalar_lea.hbm %s1849_s3, %s1141_s20 }
  0x19   : > { %s1462_s28 = scalar_lea.vmem %s1846_s0, %s1142_s25  ;;  %s1046_s25 = sshll.u32 %s163_s24, 4  ;;  %s1807_s25 = int_to_ptr.vmem [resolvable:$true] %s1046_s25 }
  0x1a   : > { %v183_v3 = vld [vmem:[%s1462_s28 + $0x28] sm:$0x1f]  ;;  %v182_v5 = vld [vmem:[%s1462_s28 + $0x20] sm:$0x1f]  ;;  %v181_v9 = vld [vmem:[%s1462_s28 + $0x18] sm:$0xff]  ;;  %s1032_s16 = scalar_lea.sflag [#allocation3], %s161_s17 }
  0x1b   : > { %v179_v6 = vld [vmem:[%s1462_s28 + $0x8] sm:$0xff]  ;;  %v187_v7 = vpack.c.bf16 %v183_v3, %v183_v3  ;;  %v186_v8 = vpack.c.bf16 %v182_v5, %v182_v5  ;;  %v178_v13 = vld [vmem:[%s1462_s28] sm:$0xff]  ;;  %v180_v14 = vld [vmem:[%s1462_s28 + $0x10] sm:$0xff]  ;;  %s1322_s30 = scalar_lea.vmem %s1807_s25, 256 }
  0x1c   : > { %v185_v12 = vpack.c.bf16 %v181_v9, %v179_v6  ;;  %v184_v15 = vpack.c.bf16 %v180_v14, %v178_v13  ;;  %p1323_p11 = scmp.ne.s32.totalorder %s1807_s25, %s1322_s30 }
  0x1d   : > { %v227_v10 = vand.u32 %v222_v4, %v187_v7  ;;  %v224_v11 = vand.u32 %v222_v4, %v186_v8 }
  0x1e   : > { %p1324_p12 = pnand %p1323_p11, %p1445_p5 }
  0x1f   : > { %241 = vmatprep.subr.bf16.mxu0 %v227_v10 }
  0x20   : > { %242 = vmatpush1.bf16.msra.mxu0 %v224_v11  ;;  %p1325_p13 = pneg %p1324_p12 }
  0x21   : > { %243 = vmatprep.subr.bf16.mxu0 %v185_v12 }
  0x24   : > { %244 = vmatpush1.bf16.msra.mxu0 %v184_v15 }
  0x27   : > { %1115 = vmatmul.mubr.msk.bf16.vlgmr.msra.gmra.mxu0 %vm206_vm2, %v1184_v16 }
  0x28   : > { %271 = vmatprep.mubr.bf16.mxu0 %v1850_v0 }
  0x2f   : > { %1116 = vmatmul.mubr.msk.bf16.gmra.mxu0 %vm206_vm2, %v1185_v17 }
  0x30   : > { %281 = vmatprep.mubr.bf16.mxu0 %v1850_v0 }
  0x37   : > { %1117 = vmatmul.mubr.msk.bf16.gmra.mxu0 %vm206_vm2, %v1186_v53 }
  0x38   : > { %291 = vmatprep.mubr.bf16.mxu0 %v1850_v0 }
  0x3f   : > { %1118 = vmatmul.mubr.msk.bf16.gmra.mxu0 %vm206_vm2, %v1187_v60 }
  0x40   : > { %1018 = vmatprep.mubr.bf16.mxu0 %v1850_v0 }
  0xe7   : > { %v263_v18 = vpop.f32.mrf.mxu0 }
  0xe9   : > { %v265_v19 = vpop.f32.mrf.mxu0 }
  0xeb   : > { %v267_v20 = vpop.f32.mrf.mxu0 }
  0xec   : > { %v300_v21 = vpack.c.bf16 %v267_v20, %v263_v18 }
  0xed   : > { %v269_v22 = vpop.f32.mrf.mxu0 }
  0xee   : > { %304 = vxpose.xlu0.c.b16.start.end [1/1] (short) %v300_v21, 128  ;;  %v301_v29 = vpack.c.bf16 %v269_v22, %v265_v19 }
  0xef   : > { %v273_v23 = vpop.f32.mrf.mxu0 }
  0xf1   : > { %v275_v24 = vpop.f32.mrf.mxu0 }
  0xf3   : > { %v277_v25 = vpop.f32.mrf.mxu0 }
  0xf4   : > { %v302_v26 = vpack.c.bf16 %v277_v25, %v273_v23 }
  0xf5   : > { %v279_v27 = vpop.f32.mrf.mxu0 }
  0xf6   : > { %v303_v28 = vpack.c.bf16 %v279_v27, %v275_v24 }
  0xf8   : > { %399 = vmatprep.subr.bf16.mxu1 %v303_v28 }
  0xf9   : > { %400 = vmatpush1.bf16.msra.mxu1 %v302_v26 }
 0x10b   : > { %320 = vxpose.xlu0.c.b16.start.end [1/1] (short) %v301_v29, 128 }
 0x150   : > { %v312_v30 = vpop.trf.xlu0 }
 0x151   : > { %1119 = vmatmul.mubr.msk.bf16.vlgmr.msra.gmra.mxu1 %vm336_vm3, %v312_v30 }
 0x152   : > { %427 = vmatprep.mubr.bf16.mxu1 %v1850_v0 }
 0x154   : > { %v313_v31 = vpop.trf.xlu0 }
 0x158   : > { %v314_v32 = vpop.trf.xlu0 }
 0x159   : > { %1120 = vmatmul.mubr.msk.bf16.gmra.mxu1 %vm336_vm3, %v313_v31 }
 0x15a   : > { %437 = vmatprep.mubr.bf16.mxu1 %v1850_v0 }
 0x15c   : > { %v315_v33 = vpop.trf.xlu0 }
 0x160   : > { %v316_v34 = vpop.trf.xlu0 }
 0x161   : > { %1121 = vmatmul.mubr.msk.bf16.gmra.mxu1 %vm336_vm3, %v314_v32 }
 0x162   : > { %447 = vmatprep.mubr.bf16.mxu1 %v1850_v0 }
 0x164   : > { %v317_v35 = vpop.trf.xlu0 }
 0x168   : > { %v318_v36 = vpop.trf.xlu0 }
 0x169   : > { %1122 = vmatmul.mubr.msk.bf16.gmra.mxu1 %vm336_vm3, %v315_v33 }
 0x16a   : > { %457 = vmatprep.mubr.bf16.mxu1 %v1850_v0 }
 0x16c   : > { %v319_v37 = vpop.trf.xlu0 }
 0x170   : > { %v328_v38 = vpop.trf.xlu0 }
 0x171   : > { %1123 = vmatmul.mubr.msk.bf16.gmra.mxu1 %vm336_vm3, %v316_v34 }
 0x172   : > { %467 = vmatprep.mubr.bf16.mxu1 %v1850_v0 }
 0x174   : > { %v329_v39 = vpop.trf.xlu0 }
 0x178   : > { %v330_v40 = vpop.trf.xlu0 }
 0x179   : > { %1124 = vmatmul.mubr.msk.bf16.gmra.mxu1 %vm336_vm3, %v317_v35 }
 0x17a   : > { %477 = vmatprep.mubr.bf16.mxu1 %v1850_v0 }
 0x17c   : > { %v331_v41 = vpop.trf.xlu0 }
 0x180   : > { %v332_v42 = vpop.trf.xlu0 }
 0x181   : > { %1125 = vmatmul.mubr.msk.bf16.gmra.mxu1 %vm336_vm3, %v318_v36 }
 0x182   : > { %487 = vmatprep.mubr.bf16.mxu1 %v1850_v0 }
 0x184   : > { %v333_v43 = vpop.trf.xlu0 }
 0x188   : > { %v334_v44 = vpop.trf.xlu0 }
 0x189   : > { %1126 = vmatmul.mubr.msk.bf16.gmra.mxu1 %vm336_vm3, %v319_v37 }
 0x18a   : > { %497 = vmatprep.mubr.bf16.mxu1 %v1850_v0 }
 0x18c   : > { %v335_v45 = vpop.trf.xlu0 }
 0x191   : > { %1127 = vmatmul.mubr.msk.bf16.gmra.mxu1 %vm336_vm3, %v328_v38 }
 0x192   : > { %507 = vmatprep.mubr.bf16.mxu1 %v1850_v0 }
 0x199   : > { %1128 = vmatmul.mubr.msk.bf16.gmra.mxu1 %vm336_vm3, %v329_v39 }
 0x19a   : > { %517 = vmatprep.mubr.bf16.mxu1 %v1850_v0 }
 0x1a1   : > { %1129 = vmatmul.mubr.msk.bf16.gmra.mxu1 %vm336_vm3, %v330_v40 }
 0x1a2   : > { %527 = vmatprep.mubr.bf16.mxu1 %v1850_v0 }
 0x1a9   : > { %1130 = vmatmul.mubr.msk.bf16.gmra.mxu1 %vm336_vm3, %v331_v41 }
 0x1aa   : > { %537 = vmatprep.mubr.bf16.mxu1 %v1850_v0 }
 0x1b1   : > { %1131 = vmatmul.mubr.msk.bf16.gmra.mxu1 %vm336_vm3, %v332_v42 }
 0x1b2   : > { %547 = vmatprep.mubr.bf16.mxu1 %v1850_v0 }
 0x1b9   : > { %1132 = vmatmul.mubr.msk.bf16.gmra.mxu1 %vm336_vm3, %v333_v43 }
 0x1ba   : > { %557 = vmatprep.mubr.bf16.mxu1 %v1850_v0 }
 0x1c1   : > { %1133 = vmatmul.mubr.msk.bf16.gmra.mxu1 %vm336_vm3, %v334_v44 }
 0x1c2   : > { %567 = vmatprep.mubr.bf16.mxu1 %v1850_v0 }
 0x1c9   : > { %1134 = vmatmul.mubr.msk.bf16.gmra.mxu1 %vm336_vm3, %v335_v45 }
 0x211   : > { %v1511_v46 = vpop.f32.mrf.mxu1 }
 0x213   : > { %v1513_v47 = vpop.f32.mrf.mxu1 }
 0x215   : > { %v1515_v48 = vpop.f32.mrf.mxu1 }
 0x217   : > { %v1517_v49 = vpop.f32.mrf.mxu1 }
 0x219   : > { %v1519_v50 = vpop.f32.mrf.mxu1 }
 0x21b   : > { %v1521_v51 = vpop.f32.mrf.mxu1 }
 0x21d   : > { %v1523_v52 = vpop.f32.mrf.mxu1 }
 0x21f   : > { %v1528_v54 = vpop.f32.mrf.mxu1 }
 0x221   : > { %v1531_v55 = vpop.f32.mrf.mxu1 }
 0x223   : > { %v1534_v56 = vpop.f32.mrf.mxu1 }
 0x224   : > { %v590_v43 = vmax.f32 %v1531_v55, %v1534_v56 }
 0x225   : > { %v1536_v57 = vpop.f32.mrf.mxu1 }
 0x227   : > { %v1538_v58 = vpop.f32.mrf.mxu1 }
 0x228   : > { %v593_v53 = vmax.f32 %v1536_v57, %v1538_v58 }
 0x229   : > { %v1540_v59 = vpop.f32.mrf.mxu1 }
 0x22b   : > { %v1545_v61 = vpop.f32.mrf.mxu1 }
 0x22c   : > { %v596_v40 = vmax.f32 %v1540_v59, %v1545_v61 }
 0x22d   : > { %v1548_v62 = vpop.f32.mrf.mxu1 }
 0x22f   : > { %v1551_v63 = vpop.f32.mrf.mxu1 }
 0x230   : > { %v599_v1 = vmax.f32 %v1548_v62, %v1551_v63 }
 0x231   : > { %v1555_v2 = vpop.f32.mrf.mxu1 }
 0x232   : > { %600 = vmax.xlane.f32.xlu0 %v599_v1 }
 0x233   : > { %v1557_v3 = vpop.f32.mrf.mxu1 }
 0x234   : > { %v602_v34 = vmax.f32 %v1555_v2, %v1557_v3 }
 0x235   : > { %v1559_v4 = vpop.f32.mrf.mxu1 }
 0x237   : > { %v1561_v5 = vpop.f32.mrf.mxu1 }
 0x238   : > { %v605_v37 = vmax.f32 %v1559_v4, %v1561_v5 }
 0x239   : > { %v1563_v6 = vpop.f32.mrf.mxu1 }
 0x23b   : > { %v1565_v7 = vpop.f32.mrf.mxu1 }
 0x23c   : > { %v608_v28 = vmax.f32 %v1563_v6, %v1565_v7 }
 0x23d   : > { %v1567_v8 = vpop.f32.mrf.mxu1 }
 0x23f   : > { %v1569_v9 = vpop.f32.mrf.mxu1 }
 0x240   : > { %v611_v31 = vmax.f32 %v1567_v8, %v1569_v9 }
 0x241   : > { %v1571_v10 = vpop.f32.mrf.mxu1 }
 0x243   : > { %v1573_v11 = vpop.f32.mrf.mxu1 }
 0x244   : > { %v614_v22 = vmax.f32 %v1571_v10, %v1573_v11 }
 0x245   : > { %v1575_v12 = vpop.f32.mrf.mxu1 }
 0x247   : > { %v1577_v13 = vpop.f32.mrf.mxu1 }
 0x248   : > { %v617_v25 = vmax.f32 %v1575_v12, %v1577_v13 }
 0x249   : > { %v1579_v14 = vpop.f32.mrf.mxu1 }
 0x24b   : > { %v1581_v15 = vpop.f32.mrf.mxu1 }
 0x24c   : > { %v620_v16 = vmax.f32 %v1579_v14, %v1581_v15 }
 0x24d   : > { %v1585_v17 = vpop.f32.mrf.mxu1 }
 0x24e   : > { %621 = vmax.xlane.f32.xlu1 %v620_v16  ;;  %v584_v16 = vmax.f32 %v1519_v50, %v1521_v51 }
 0x24f   : > { %v1587_v18 = vpop.f32.mrf.mxu1 }
 0x250   : > { %v623_v19 = vmax.f32 %v1585_v17, %v1587_v18 }
 0x251   : > { %v1591_v20 = vpop.f32.mrf.mxu1 }
 0x252   : > { %1866 = vst [vmem:[#allocation5_spill] sm:$0xff] %v1591_v20  ;;  %624 = vmax.xlane.f32.xlu1 %v623_v19 }
 0x253   : > { %v1593_v21 = vpop.f32.mrf.mxu1 }
 0x254   : > { %1867 = vst [vmem:[#allocation6_spill] sm:$0xff] %v1593_v21 }
 0x255   : > { %v1597_v23 = vpop.f32.mrf.mxu1 }
 0x256   : > { %1868 = vst [vmem:[#allocation7_spill] sm:$0xff] %v1597_v23  ;;  %615 = vmax.xlane.f32.xlu1 %v614_v22 }
 0x257   : > { %v1599_v24 = vpop.f32.mrf.mxu1 }
 0x259   : > { %v1603_v26 = vpop.f32.mrf.mxu1 }
 0x25a   : > { %1869 = vst [vmem:[#allocation8_spill] sm:$0xff] %v1603_v26  ;;  %618 = vmax.xlane.f32.xlu1 %v617_v25  ;;  %v587_v25 = vmax.f32 %v1523_v52, %v1528_v54 }
 0x25b   : > { %v1605_v27 = vpop.f32.mrf.mxu1 }
 0x25c   : > { %1870 = vst [vmem:[#allocation9_spill] sm:$0xff] %v1605_v27 }
 0x25d   : > { %v1609_v29 = vpop.f32.mrf.mxu1 }
 0x25e   : > { %1871 = vst [vmem:[#allocation10_spill] sm:$0xff] %v1609_v29  ;;  %609 = vmax.xlane.f32.xlu1 %v608_v28 }
 0x25f   : > { %v1611_v30 = vpop.f32.mrf.mxu1 }
 0x261   : > { %v1615_v32 = vpop.f32.mrf.mxu1 }
 0x262   : > { %1872 = vst [vmem:[#allocation11_spill] sm:$0xff] %v1615_v32  ;;  %612 = vmax.xlane.f32.xlu1 %v611_v31 }
 0x263   : > { %v1617_v33 = vpop.f32.mrf.mxu1 }
 0x264   : > { %1873 = vst [vmem:[#allocation12_spill] sm:$0xff] %v1617_v33 }
 0x265   : > { %v1621_v35 = vpop.f32.mrf.mxu1 }
 0x266   : > { %1874 = vst [vmem:[#allocation13_spill] sm:$0xff] %v1621_v35  ;;  %603 = vmax.xlane.f32.xlu1 %v602_v34 }
 0x267   : > { %v1623_v36 = vpop.f32.mrf.mxu1 }
 0x269   : > { %v1627_v38 = vpop.f32.mrf.mxu1 }
 0x26a   : > { %1875 = vst [vmem:[#allocation14_spill] sm:$0xff] %v1627_v38  ;;  %606 = vmax.xlane.f32.xlu1 %v605_v37  ;;  %v578_v37 = vmax.f32 %v1511_v46, %v1513_v47 }
 0x26b   : > { %v1629_v39 = vpop.f32.mrf.mxu1 }
 0x26c   : > { %1876 = vst [vmem:[#allocation15_spill] sm:$0xff] %v1629_v39 }
 0x26d   : > { %v1633_v41 = vpop.f32.mrf.mxu1 }
 0x26e   : > { %597 = vmax.xlane.f32.xlu1 %v596_v40 }
 0x26f   : > { %v1635_v42 = vpop.f32.mrf.mxu1 }
 0x271   : > { %v1639_v44 = vpop.f32.mrf.mxu1 }
 0x272   : > { %1877 = vst [vmem:[#allocation16_spill] sm:$0xff] %v1639_v44  ;;  %591 = vmax.xlane.f32.xlu1 %v590_v43 }
 0x273   : > { %v1641_v45 = vpop.f32.mrf.mxu1 }
 0x274   : > { %1878 = vst [vmem:[#allocation17_spill] sm:$0xff] %v1641_v45  ;;  %v650_v40 = vmax.f32 %v1639_v44, %v1641_v45  ;;  %v638_v44 = vmax.f32 %v1615_v32, %v1617_v33 }
 0x275   : > { %v1645_v60 = vpop.f32.mrf.mxu1 }
 0x276   : > { %594 = vmax.xlane.f32.xlu1 %v593_v53 }
 0x277   : > { %v1647_v1 = vpop.f32.mrf.mxu1 }
 0x279   : > { %v1651_v19 = vpop.f32.mrf.mxu1 }
 0x27a   : > { %585 = vmax.xlane.f32.xlu1 %v584_v16  ;;  %v581_v16 = vmax.f32 %v1515_v48, %v1517_v49 }
 0x27b   : > { %v1653_v22 = vpop.f32.mrf.mxu1 }
 0x27c   : > { %v656_v28 = vmax.f32 %v1651_v19, %v1653_v22 }
 0x27d   : > { %v1659_v31 = vpop.f32.mrf.mxu1 }
 0x27e   : > { %588 = vmax.xlane.f32.xlu1 %v587_v25  ;;  %657 = vmax.xlane.f32.xlu0 %v656_v28  ;;  %v644_v25 = vmax.f32 %v1627_v38, %v1629_v39 }
 0x27f   : > { %v1661_v34 = vpop.f32.mrf.mxu1 }
 0x281   : > { %v1667_v43 = vpop.f32.mrf.mxu1 }
 0x282   : > { %579 = vmax.xlane.f32.xlu1 %v578_v37  ;;  %651 = vmax.xlane.f32.xlu0 %v650_v40  ;;  %v632_v40 = vmax.f32 %v1603_v26, %v1605_v27 }
 0x283   : > { %v1669_v53 = vpop.f32.mrf.mxu1 }
 0x284   : > { %v662_v26 = vmax.f32 %v1667_v43, %v1669_v53 }
 0x285   : > { %v1675_v28 = vpop.f32.mrf.mxu1 }
 0x286   : > { %582 = vmax.xlane.f32.xlu1 %v581_v16  ;;  %645 = vmax.xlane.f32.xlu0 %v644_v25  ;;  %v626_v25 = vmax.f32 %v1591_v20, %v1593_v21 }
 0x287   : > { %v1677_v0 = vpop.f32.mrf.mxu1 }
 0x288   : > { %v665_v27 = vmax.f32 %v1675_v28, %v1677_v0 }
 0x289   : > { %v1681_v45 = vpop.f32.mrf.mxu1 }
 0x28a   : > { %639 = vmax.xlane.f32.xlu0 %v638_v44 }
 0x28b   : > { %v1683_v37 = vpop.f32.mrf.mxu1 }
 0x28c   : > { %v668_v38 = vmax.f32 %v1681_v45, %v1683_v37 }
 0x28d   : > { %v1689_v39 = vpop.f32.mrf.mxu1 }
 0x28e   : > { %633 = vmax.xlane.f32.xlu0 %v632_v40  ;;  %669 = vmax.xlane.f32.xlu1 %v668_v38  ;;  %v659_v38 = vmax.f32 %v1659_v31, %v1661_v34  ;;  %v653_v40 = vmax.f32 %v1645_v60, %v1647_v1 }
 0x28f   : > { %v1691_v16 = vpop.f32.mrf.mxu1 }
 0x290   : > { %v671_v44 = vmax.f32 %v1689_v39, %v1691_v16 }
 0x292   : > { %627 = vmax.xlane.f32.xlu0 %v626_v25  ;;  %672 = vmax.xlane.f32.xlu1 %v671_v44  ;;  %v647_v25 = vmax.f32 %v1633_v41, %v1635_v42  ;;  %v641_v44 = vmax.f32 %v1621_v35, %v1623_v36 }
 0x296   : > { %663 = vmax.xlane.f32.xlu1 %v662_v26  ;;  %v635_v26 = vmax.f32 %v1609_v29, %v1611_v30 }
 0x29a   : > { %666 = vmax.xlane.f32.xlu1 %v665_v27  ;;  %v629_v27 = vmax.f32 %v1597_v23, %v1599_v24 }
 0x29e   : > { %660 = vmax.xlane.f32.xlu1 %v659_v38 }
 0x2a2   : > { %654 = vmax.xlane.f32.xlu1 %v653_v40 }
 0x2a6   : > { %648 = vmax.xlane.f32.xlu1 %v647_v25 }
 0x2aa   : > { %642 = vmax.xlane.f32.xlu1 %v641_v44 }
 0x2ae   : > { %636 = vmax.xlane.f32.xlu1 %v635_v26 }
 0x2b2   : > { %630 = vmax.xlane.f32.xlu1 %v629_v27 }
 0x2d7   : > { %v622_v38 = vpop.xlane.xlu1 %621 }
 0x2d8   : > { %v702_v20 = vsub.f32 %v1579_v14, %v622_v38  ;;  %v703_v40 = vsub.f32 %v1581_v15, %v622_v38  ;;  %v1719_v14 = vpop.f32.mrf.mxu0 }
 0x2da   : > { %v794_v21 = vmul.f32 1.442695, %v702_v20  ;;  %v796_v32 = vmul.f32 1.442695, %v703_v40 }
 0x2db   : > { %v625_v25 = vpop.xlane.xlu1 %624 }
 0x2dc   : > { %v704_v33 = vsub.f32 %v1585_v17, %v625_v25  ;;  %v705_v44 = vsub.f32 %v1587_v18, %v625_v25  ;;  %1188 = vpow2.f32 %v794_v21  ;;  %v285_v21 = vpop.f32.mrf.mxu0 }
 0x2dd   : > { %1190 = vpow2.f32 %v796_v32 }
 0x2de   : > { %v798_v35 = vmul.f32 1.442695, %v704_v33  ;;  %v800_v29 = vmul.f32 1.442695, %v705_v44  ;;  %v1723_v40 = vpop.f32.mrf.mxu0 }
 0x2df   : > { %v616_v26 = vpop.xlane.xlu1 %615 }
 0x2e0   : > { %1192 = vpow2.f32 %v798_v35  ;;  %v698_v27 = vsub.f32 %v1571_v10, %v616_v26  ;;  %v699_v23 = vsub.f32 %v1573_v11, %v616_v26  ;;  %v898_v11 = vpack.c.bf16 %v1723_v40, %v1719_v14  ;;  %v289_v35 = vpop.f32.mrf.mxu0 }
 0x2e1   : > { %1194 = vpow2.f32 %v800_v29 }
 0x2e2   : > { %v786_v15 = vmul.f32 1.442695, %v698_v27  ;;  %v788_v20 = vmul.f32 1.442695, %v699_v23 }
 0x2e3   : > { %v619_v38 = vpop.xlane.xlu1 %618 }
 0x2e4   : > { %v700_v17 = vsub.f32 %v1575_v12, %v619_v38  ;;  %v701_v18 = vsub.f32 %v1577_v13, %v619_v38  ;;  %1196 = vpow2.f32 %v786_v15  ;;  %v899_v12 = vpack.c.bf16 %v289_v35, %v285_v21  ;;  %v1731_v38 = vpop.f32.mrf.mxu0 }
 0x2e5   : > { %1198 = vpow2.f32 %v788_v20 }
 0x2e6   : > { %v790_v33 = vmul.f32 1.442695, %v700_v17  ;;  %v792_v32 = vmul.f32 1.442695, %v701_v18  ;;  %934 = vmatprep.mubr.bf16.mxu1 %v899_v12 }
 0x2e7   : > { %v610_v10 = vpop.xlane.xlu1 %609 }
 0x2e8   : > { %1200 = vpow2.f32 %v790_v33  ;;  %v694_v29 = vsub.f32 %v1563_v6, %v610_v10  ;;  %v695_v23 = vsub.f32 %v1565_v7, %v610_v10 }
 0x2e9   : > { %1202 = vpow2.f32 %v792_v32  ;;  %v1189_v25 = vpop.eup %1188  ;;  %v1733_v32 = vpop.f32.mrf.mxu0 }
 0x2ea   : > { %v778_v13 = vmul.f32 1.442695, %v694_v29  ;;  %v780_v44 = vmul.f32 1.442695, %v695_v23  ;;  %v1191_v27 = vpop.eup %1190 }
 0x2eb   : > { %v613_v26 = vpop.xlane.xlu1 %612  ;;  %v297_v23 = vpop.f32.mrf.mxu0 }
 0x2ec   : > { %v696_v15 = vsub.f32 %v1567_v8, %v613_v26  ;;  %v697_v20 = vsub.f32 %v1569_v9, %v613_v26  ;;  %1204 = vpow2.f32 %v778_v13  ;;  %v601_v9 = vpop.xlane.xlu0 %600 }
 0x2ed   : > { %v1193_v17 = vpop.eup %1192  ;;  %1206 = vpow2.f32 %v780_v44  ;;  %v298_v12 = vpop.f32.mrf.mxu0  ;;  %v689_v44 = vsub.f32 %v1551_v63, %v601_v9  ;;  %v688_v63 = vsub.f32 %v1548_v62, %v601_v9 }
 0x2ee   : > { %v1195_v18 = vpop.eup %1194  ;;  %v782_v6 = vmul.f32 1.442695, %v696_v15  ;;  %v784_v7 = vmul.f32 1.442695, %v697_v20  ;;  %v880_v33 = vpack.c.bf16 %v1193_v17, %v1189_v25 }
 0x2ef   : > { %v604_v21 = vpop.xlane.xlu1 %603  ;;  %v881_v10 = vpack.c.bf16 %v1195_v18, %v1191_v27 }
 0x2f0   : > { %1208 = vpow2.f32 %v782_v6  ;;  %v690_v29 = vsub.f32 %v1555_v2, %v604_v21  ;;  %v691_v8 = vsub.f32 %v1557_v3, %v604_v21  ;;  %v768_v21 = vmul.f32 1.442695, %v689_v44 }
 0x2f1   : > { %1210 = vpow2.f32 %v784_v7  ;;  %902 = vmatprep.subr.bf16.mxu1 %v881_v10  ;;  %v1197_v13 = vpop.eup %1196 }
 0x2f2   : > { %v770_v35 = vmul.f32 1.442695, %v690_v29  ;;  %903 = vmatpush1.bf16.xpose.msra.mxu1 %v880_v33  ;;  %v772_v26 = vmul.f32 1.442695, %v691_v8  ;;  %v1199_v15 = vpop.eup %1198 }
 0x2f3   : > { %v607_v25 = vpop.xlane.xlu1 %606 }
 0x2f4   : > { %v692_v27 = vsub.f32 %v1559_v4, %v607_v25  ;;  %v693_v20 = vsub.f32 %v1561_v5, %v607_v25  ;;  %1212 = vpow2.f32 %v770_v35 }
 0x2f5   : > { %v1201_v2 = vpop.eup %1200  ;;  %1214 = vpow2.f32 %v772_v26  ;;  %v766_v26 = vmul.f32 1.442695, %v688_v63 }
 0x2f6   : > { %v1203_v17 = vpop.eup %1202  ;;  %v774_v3 = vmul.f32 1.442695, %v692_v27  ;;  %v776_v18 = vmul.f32 1.442695, %v693_v20  ;;  %v878_v6 = vpack.c.bf16 %v1201_v2, %v1197_v13 }
 0x2f7   : > { %v598_v7 = vpop.xlane.xlu1 %597  ;;  %v879_v33 = vpack.c.bf16 %v1203_v17, %v1199_v15 }
 0x2f8   : > { %1216 = vpow2.f32 %v774_v3  ;;  %v686_v10 = vsub.f32 %v1540_v59, %v598_v7  ;;  %v687_v29 = vsub.f32 %v1545_v61, %v598_v7 }
 0x2f9   : > { %1218 = vpow2.f32 %v776_v18  ;;  %904 = vmatprep.subr.bf16.mxu1 %v879_v33  ;;  %v1205_v5 = vpop.eup %1204 }
 0x2fa   : > { %v764_v4 = vmul.f32 1.442695, %v687_v29  ;;  %905 = vmatpush1.bf16.xpose.msra.mxu1 %v878_v6  ;;  %v762_v8 = vmul.f32 1.442695, %v686_v10  ;;  %v1207_v35 = vpop.eup %1206  ;;  %1220 = vpow2.f32 %v768_v21 }
 0x2fb   : > { %v592_v23 = vpop.xlane.xlu1 %591 }
 0x2fc   : > { %v683_v12 = vsub.f32 %v1534_v56, %v592_v23  ;;  %1222 = vpow2.f32 %v764_v4  ;;  %v682_v27 = vsub.f32 %v1531_v55, %v592_v23 }
 0x2fd   : > { %v1209_v13 = vpop.eup %1208  ;;  %1224 = vpow2.f32 %v762_v8 }
 0x2fe   : > { %v1211_v25 = vpop.eup %1210  ;;  %v876_v59 = vpack.c.bf16 %v1209_v13, %v1205_v5  ;;  %v756_v62 = vmul.f32 1.442695, %v683_v12  ;;  %1226 = vpow2.f32 %v766_v26  ;;  %v754_v33 = vmul.f32 1.442695, %v682_v27 }
 0x2ff   : > { %v595_v61 = vpop.xlane.xlu1 %594  ;;  %v877_v15 = vpack.c.bf16 %v1211_v25, %v1207_v35 }
 0x300   : > { %v684_v9 = vsub.f32 %v1536_v57, %v595_v61  ;;  %v685_v44 = vsub.f32 %v1538_v58, %v595_v61  ;;  %1228 = vpow2.f32 %v756_v62 }
 0x301   : > { %906 = vmatprep.subr.bf16.mxu1 %v877_v15  ;;  %v1213_v56 = vpop.eup %1212 }
 0x302   : > { %v760_v20 = vmul.f32 1.442695, %v685_v44  ;;  %907 = vmatpush1.bf16.xpose.msra.mxu1 %v876_v59  ;;  %v1215_v17 = vpop.eup %1214  ;;  %v758_v3 = vmul.f32 1.442695, %v684_v9 }
 0x303   : > { %v586_v2 = vpop.xlane.xlu1 %585 }
 0x304   : > { %v679_v18 = vsub.f32 %v1521_v51, %v586_v2  ;;  %1230 = vpow2.f32 %v760_v20  ;;  %v678_v5 = vsub.f32 %v1519_v50, %v586_v2 }
 0x305   : > { %v1217_v6 = vpop.eup %1216  ;;  %1232 = vpow2.f32 %v758_v3 }
 0x306   : > { %v1219_v7 = vpop.eup %1218  ;;  %v874_v57 = vpack.c.bf16 %v1217_v6, %v1213_v56  ;;  %v748_v10 = vmul.f32 1.442695, %v679_v18  ;;  %1234 = vpow2.f32 %v754_v33  ;;  %v746_v26 = vmul.f32 1.442695, %v678_v5 }
 0x307   : > { %v589_v21 = vpop.xlane.xlu1 %588  ;;  %v875_v58 = vpack.c.bf16 %v1219_v7, %v1215_v17  ;;  %v1221_v63 = vpop.eup %1220 }
 0x308   : > { %v680_v55 = vsub.f32 %v1523_v52, %v589_v21  ;;  %v681_v29 = vsub.f32 %v1528_v54, %v589_v21  ;;  %1236 = vpow2.f32 %v748_v10 }
 0x309   : > { %908 = vmatprep.subr.bf16.mxu1 %v875_v58  ;;  %v1223_v4 = vpop.eup %1222 }
 0x30a   : > { %v752_v51 = vmul.f32 1.442695, %v681_v29  ;;  %909 = vmatpush1.bf16.xpose.msra.mxu1 %v874_v57  ;;  %v873_v23 = vpack.c.bf16 %v1221_v63, %v1223_v4  ;;  %v1225_v35 = vpop.eup %1224  ;;  %v750_v12 = vmul.f32 1.442695, %v680_v55 }
 0x30b   : > { %v580_v8 = vpop.xlane.xlu1 %579  ;;  %v1227_v52 = vpop.eup %1226 }
 0x30c   : > { %v675_v13 = vsub.f32 %v1513_v47, %v580_v8  ;;  %1238 = vpow2.f32 %v752_v51  ;;  %910 = vmatprep.subr.bf16.mxu1 %v873_v23  ;;  %v872_v25 = vpack.c.bf16 %v1227_v52, %v1225_v35  ;;  %v674_v9 = vsub.f32 %v1511_v46, %v580_v8  ;;  %v658_v51 = vpop.xlane.xlu0 %657 }
 0x30d   : > { %1240 = vpow2.f32 %v750_v12  ;;  %v1229_v15 = vpop.eup %1228  ;;  %v727_v12 = vsub.f32 %v1653_v22, %v658_v51 }
 0x30e   : > { %v740_v59 = vmul.f32 1.442695, %v675_v13  ;;  %1242 = vpow2.f32 %v746_v26  ;;  %v738_v56 = vmul.f32 1.442695, %v674_v9  ;;  %v726_v9 = vsub.f32 %v1651_v19, %v658_v51 }
 0x30f   : > { %v583_v54 = vpop.xlane.xlu1 %582 }
 0x310   : > { %v676_v61 = vsub.f32 %v1515_v48, %v583_v54  ;;  %v677_v50 = vsub.f32 %v1517_v49, %v583_v54  ;;  %1244 = vpow2.f32 %v740_v59 }
 0x311   : > { %v1231_v62 = vpop.eup %1230 }
 0x312   : > { %v744_v44 = vmul.f32 1.442695, %v677_v50  ;;  %911 = vmatpush1.bf16.xpose.msra.mxu1 %v872_v25  ;;  %v871_v47 = vpack.c.bf16 %v1231_v62, %v1229_v15  ;;  %v742_v27 = vmul.f32 1.442695, %v676_v61  ;;  %v1233_v20 = vpop.eup %1232  ;;  %v652_v62 = vpop.xlane.xlu0 %651 }
 0x313   : > { %v1235_v2 = vpop.eup %1234 }
 0x314   : > { %1246 = vpow2.f32 %v744_v44  ;;  %912 = vmatprep.subr.bf16.mxu1 %v871_v47  ;;  %v870_v49 = vpack.c.bf16 %v1233_v20, %v1235_v2 }
 0x315   : > { %1248 = vpow2.f32 %v742_v27  ;;  %v1237_v3 = vpop.eup %1236  ;;  %v1879_v27 = vld [vmem:[#allocation17_spill] sm:$0xff] }
 0x316   : > { %1250 = vpow2.f32 %v738_v56  ;;  %v723_v20 = vsub.f32 %v1879_v27, %v652_v62  ;;  %v1886_v27 = vld [vmem:[#allocation9_spill] sm:$0xff] }
 0x317   : > { %v670_v17 = vpop.xlane.xlu1 %669 }
 0x318   : > { %v734_v48 = vsub.f32 %v1681_v45, %v670_v17  ;;  %v735_v18 = vsub.f32 %v1683_v37, %v670_v17 }
 0x319   : > { %v1239_v6 = vpop.eup %1238 }
 0x31a   : > { %913 = vmatpush1.bf16.xpose.msra.mxu1 %v870_v49  ;;  %v869_v7 = vpack.c.bf16 %v1239_v6, %v1237_v3  ;;  %v858_v33 = vmul.f32 1.442695, %v734_v48  ;;  %v1241_v21 = vpop.eup %1240  ;;  %v860_v58 = vmul.f32 1.442695, %v735_v18  ;;  %v842_v49 = vmul.f32 1.442695, %v726_v9 }
 0x31b   : > { %v673_v46 = vpop.xlane.xlu1 %672  ;;  %v1243_v29 = vpop.eup %1242  ;;  %v836_v18 = vmul.f32 1.442695, %v723_v20 }
 0x31c   : > { %v736_v57 = vsub.f32 %v1689_v39, %v673_v46  ;;  %v737_v10 = vsub.f32 %v1691_v16, %v673_v46  ;;  %914 = vmatprep.subr.bf16.mxu1 %v869_v7  ;;  %1252 = vpow2.f32 %v858_v33  ;;  %v868_v4 = vpack.c.bf16 %v1241_v21, %v1243_v29  ;;  %v646_v46 = vpop.xlane.xlu0 %645  ;;  %v1880_v33 = vld [vmem:[#allocation16_spill] sm:$0xff] }
 0x31d   : > { %v1245_v5 = vpop.eup %1244  ;;  %1254 = vpow2.f32 %v860_v58  ;;  %v1881_v58 = vld [vmem:[#allocation15_spill] sm:$0xff] }
 0x31e   : > { %v862_v55 = vmul.f32 1.442695, %v736_v57  ;;  %v864_v45 = vmul.f32 1.442695, %v737_v10  ;;  %v722_v57 = vsub.f32 %v1880_v33, %v652_v62  ;;  %v719_v10 = vsub.f32 %v1881_v58, %v646_v46  ;;  %v1888_v33 = vld [vmem:[#allocation8_spill] sm:$0xff] }
 0x31f   : > { %v664_v63 = vpop.xlane.xlu1 %663 }
 0x320   : > { %v731_v37 = vsub.f32 %v1669_v53, %v664_v63  ;;  %1256 = vpow2.f32 %v862_v55  ;;  %v730_v39 = vsub.f32 %v1667_v43, %v664_v63  ;;  %v844_v43 = vmul.f32 1.442695, %v727_v12  ;;  %v1882_v12 = vld [vmem:[#allocation14_spill] sm:$0xff] }
 0x321   : > { %v1247_v8 = vpop.eup %1246  ;;  %1258 = vpow2.f32 %v864_v45 }
 0x322   : > { %915 = vmatpush1.bf16.xpose.msra.mxu1 %v868_v4  ;;  %v852_v23 = vmul.f32 1.442695, %v731_v37  ;;  %v867_v35 = vpack.c.bf16 %v1247_v8, %v1245_v5  ;;  %v1249_v53 = vpop.eup %1248  ;;  %v850_v26 = vmul.f32 1.442695, %v730_v39  ;;  %v834_v4 = vmul.f32 1.442695, %v722_v57  ;;  %v640_v39 = vpop.xlane.xlu0 %639 }
 0x323   : > { %v667_v16 = vpop.xlane.xlu1 %666  ;;  %v1251_v59 = vpop.eup %1250 }
 0x324   : > { %v732_v13 = vsub.f32 %v1675_v28, %v667_v16  ;;  %v733_v52 = vsub.f32 %v1677_v0, %v667_v16  ;;  %916 = vmatprep.subr.bf16.mxu1 %v867_v35  ;;  %1260 = vpow2.f32 %v852_v23  ;;  %v866_v15 = vpack.c.bf16 %v1249_v53, %v1251_v59 }
 0x326   : > { %v854_v54 = vmul.f32 1.442695, %v732_v13  ;;  %v856_v25 = vmul.f32 1.442695, %v733_v52  ;;  %v718_v13 = vsub.f32 %v1882_v12, %v646_v46  ;;  %v1883_v52 = vld [vmem:[#allocation12_spill] sm:$0xff]  ;;  %v634_v62 = vpop.xlane.xlu0 %633 }
 0x327   : > { %v661_v61 = vpop.xlane.xlu1 %660  ;;  %v715_v53 = vsub.f32 %v1883_v52, %v640_v39  ;;  %v711_v20 = vsub.f32 %v1886_v27, %v634_v62  ;;  %v710_v57 = vsub.f32 %v1888_v33, %v634_v62 }
 0x328   : > { %1262 = vpow2.f32 %v854_v54  ;;  %v729_v50 = vsub.f32 %v1661_v34, %v661_v61  ;;  %v728_v22 = vsub.f32 %v1659_v31, %v661_v61  ;;  %v826_v61 = vmul.f32 1.442695, %v718_v13 }
 0x329   : > { %1264 = vpow2.f32 %v856_v25  ;;  %v1253_v47 = vpop.eup %1252 }
 0x32a   : > { %1266 = vpow2.f32 %v850_v26  ;;  %v848_v28 = vmul.f32 1.442695, %v729_v50  ;;  %917 = vmatpush1.bf16.xpose.msra.mxu1 %v866_v15  ;;  %v1255_v56 = vpop.eup %1254  ;;  %v846_v34 = vmul.f32 1.442695, %v728_v22 }
 0x32b   : > { %v655_v0 = vpop.xlane.xlu1 %654  ;;  %1268 = vpow2.f32 %v844_v43 }
 0x32c   : > { %v725_v44 = vsub.f32 %v1647_v1, %v655_v0  ;;  %1270 = vpow2.f32 %v848_v28  ;;  %v724_v19 = vsub.f32 %v1645_v60, %v655_v0 }
 0x32d   : > { %v1257_v2 = vpop.eup %1256  ;;  %1272 = vpow2.f32 %v846_v34 }
 0x32e   : > { %v840_v17 = vmul.f32 1.442695, %v725_v44  ;;  %v1259_v48 = vpop.eup %1258  ;;  %v896_v31 = vpack.c.bf16 %v1257_v2, %v1253_v47  ;;  %v838_v29 = vmul.f32 1.442695, %v724_v19  ;;  %v1885_v44 = vld [vmem:[#allocation11_spill] sm:$0xff] }
 0x32f   : > { %v649_v3 = vpop.xlane.xlu1 %648  ;;  %v897_v6 = vpack.c.bf16 %v1259_v48, %v1255_v56  ;;  %v714_v47 = vsub.f32 %v1885_v44, %v640_v39 }
 0x330   : > { %1274 = vpow2.f32 %v840_v17  ;;  %v721_v1 = vsub.f32 %v1635_v42, %v649_v3  ;;  %v828_v42 = vmul.f32 1.442695, %v719_v10  ;;  %v720_v23 = vsub.f32 %v1633_v41, %v649_v3 }
 0x331   : > { %918 = vmatprep.subr.bf16.mxu1 %v897_v6  ;;  %v1261_v7 = vpop.eup %1260  ;;  %1276 = vpow2.f32 %v842_v49  ;;  %v820_v41 = vmul.f32 1.442695, %v715_v53  ;;  %v818_v48 = vmul.f32 1.442695, %v714_v47  ;;  %v628_v6 = vpop.xlane.xlu0 %627 }
 0x332   : > { %919 = vmatpush2.bf16.xpose.msra.mxu1 %v896_v31  ;;  %1278 = vpow2.f32 %v836_v18  ;;  %v832_v63 = vmul.f32 1.442695, %v721_v1  ;;  %v830_v26 = vmul.f32 1.442695, %v720_v23  ;;  %v812_v31 = vmul.f32 1.442695, %v711_v20 }
 0x333   : > { %v643_v60 = vpop.xlane.xlu1 %642  ;;  %1280 = vpow2.f32 %v838_v29  ;;  %v955_v20 = vlaneseq }
 0x334   : > { %1282 = vpow2.f32 %v832_v63  ;;  %v717_v16 = vsub.f32 %v1623_v36, %v643_v60  ;;  %v1884_v36 = vld [vmem:[#allocation13_spill] sm:$0xff]  ;;  %v810_v63 = vmul.f32 1.442695, %v710_v57 }
 0x335   : > { %v1263_v21 = vpop.eup %1262  ;;  %1284 = vpow2.f32 %v834_v4  ;;  %v716_v22 = vsub.f32 %v1884_v36, %v643_v60  ;;  %v901_v36 = vpack.c.bf16 %v1733_v32, %v1733_v32 }
 0x336   : > { %v1265_v55 = vpop.eup %1264  ;;  %1286 = vpow2.f32 %v828_v42  ;;  %v824_v25 = vmul.f32 1.442695, %v717_v16 }
 0x337   : > { %v1267_v45 = vpop.eup %1266  ;;  %v895_v37 = vpack.c.bf16 %v1265_v55, %v1261_v7  ;;  %v637_v43 = vpop.xlane.xlu1 %636  ;;  %1288 = vpow2.f32 %v830_v26  ;;  %v822_v56 = vmul.f32 1.442695, %v716_v22  ;;  %v900_v22 = vpack.c.bf16 %v1731_v38, %v1731_v38 }
 0x338   : > { %v894_v5 = vpack.c.bf16 %v1263_v21, %v1267_v45  ;;  %v1269_v51 = vpop.eup %1268  ;;  %1290 = vpow2.f32 %v824_v25  ;;  %v713_v0 = vsub.f32 %v1611_v30, %v637_v43  ;;  %v1887_v30 = vld [vmem:[#allocation10_spill] sm:$0xff] }
 0x339   : > { %920 = vmatprep.subr.bf16.mxu1 %v895_v37  ;;  %v1271_v8 = vpop.eup %1270  ;;  %1292 = vpow2.f32 %v826_v61  ;;  %v712_v46 = vsub.f32 %v1887_v30, %v637_v43  ;;  %v1889_v21 = vld [vmem:[#allocation6_spill] sm:$0xff] }
 0x33a   : > { %v893_v35 = vpack.c.bf16 %v1271_v8, %v1269_v51  ;;  %921 = vmatpush2.bf16.xpose.msra.mxu1 %v894_v5  ;;  %v1273_v54 = vpop.eup %1272  ;;  %1294 = vpow2.f32 %v820_v41  ;;  %v816_v2 = vmul.f32 1.442695, %v713_v0  ;;  %v707_v58 = vsub.f32 %v1889_v21, %v628_v6  ;;  %v1890_v5 = vld [vmem:[#allocation7_spill] sm:$0xff]  ;;  %v1891_v8 = vld [vmem:[#allocation5_spill] sm:$0xff] }
 0x33b   : > { %v631_v49 = vpop.xlane.xlu1 %630  ;;  %1296 = vpow2.f32 %v822_v56  ;;  %v814_v10 = vmul.f32 1.442695, %v712_v46  ;;  %v706_v39 = vsub.f32 %v1891_v8, %v628_v6  ;;  %v177_v21 = vld [vmem:[%s1848_s2] sm:$0xf] }
 0x33c   : > { %922 = vmatprep.subr.bf16.mxu1 %v893_v35  ;;  %1298 = vpow2.f32 %v816_v2  ;;  %v709_v1 = vsub.f32 %v1599_v24, %v631_v49  ;;  %v804_v4 = vmul.f32 1.442695, %v707_v58  ;;  %v708_v24 = vsub.f32 %v1890_v5, %v631_v49 }
 0x33d   : > { %v1275_v59 = vpop.eup %1274  ;;  %1300 = vpow2.f32 %v818_v48  ;;  %v802_v12 = vmul.f32 1.442695, %v706_v39 }
 0x33e   : > { %v1277_v50 = vpop.eup %1276  ;;  %1302 = vpow2.f32 %v812_v31  ;;  %v808_v29 = vmul.f32 1.442695, %v709_v1  ;;  %v806_v23 = vmul.f32 1.442695, %v708_v24 }
 0x33f   : > { %v1279_v15 = vpop.eup %1278  ;;  %v892_v28 = vpack.c.bf16 %v1273_v54, %v1277_v50  ;;  %1304 = vpow2.f32 %v814_v10  ;;  %v1320_v10 = vld [vmem:[%s1462_s28] sm:$0xff] }
 0x340   : > { %v891_v9 = vpack.c.bf16 %v1275_v59, %v1279_v15  ;;  %v1281_v34 = vpop.eup %1280  ;;  %1306 = vpow2.f32 %v808_v29 }
 0x341   : > { %v1283_v17 = vpop.eup %1282  ;;  %1308 = vpow2.f32 %v810_v63 }
 0x342   : > { %923 = vmatpush2.bf16.xpose.msra.mxu1 %v892_v28  ;;  %v1285_v3 = vpop.eup %1284  ;;  %1310 = vpow2.f32 %v804_v4 }
 0x343   : > { %924 = vmatprep.subr.bf16.mxu1 %v891_v9  ;;  %v1287_v18 = vpop.eup %1286  ;;  %v890_v19 = vpack.c.bf16 %v1281_v34, %v1285_v3  ;;  %1312 = vpow2.f32 %v806_v23  ;;  %v956_v34 = vshrl.u32 %v955_v20, 7  ;;  %v1892_v3 = vmov 0  }
 0x344   : > { %v889_v7 = vpack.c.bf16 %v1283_v17, %v1287_v18  ;;  %v1289_v55 = vpop.eup %1288  ;;  %1314 = vpow2.f32 %v802_v12  ;;  %v979_v31 = vsel %vm977_vm4, 65535, %v1892_v3 }
 0x345   : > { %v1291_v45 = vpop.eup %1290  ;;  %v957_v2 = vsub.s32 0, %v956_v34 }
 0x346   : > { %v1293_v37 = vpop.eup %1292 }
 0x347   : > { %v1295_v60 = vpop.eup %1294  ;;  %v888_v51 = vpack.c.bf16 %v1289_v55, %v1293_v37 }
 0x348   : > { %v887_v42 = vpack.c.bf16 %v1291_v45, %v1295_v60  ;;  %v1297_v16 = vpop.eup %1296  ;;  %v1321_v45 = vld [vmem:[%s1462_s28 + $0x8] sm:$0xff]  ;;  %s1386_s28 = smov [#allocation2]  }
 0x349   : > { %v1299_v35 = vpop.eup %1298  ;;  %s1326_s4 = sshll.u32 %s1386_s28, 4  ;;  %s1327_s4 = int_to_ptr.vmem [resolvable:$false] %s1326_s4 }
 0x34a   : > { %925 = vmatpush2.bf16.xpose.msra.mxu1 %v890_v19  ;;  %v1301_v13 = vpop.eup %1300  ;;  %s1328_s5 = scalar_lea.vmem %s1327_s4, 512  ;;  %p1329_p0 = scmp.lt.s32.totalorder %s1807_s25, %s1327_s4 }
 0x34b   : > { %926 = vmatprep.subr.bf16.mxu1 %v889_v7  ;;  %v1303_v52 = vpop.eup %1302  ;;  %v886_v53 = vpack.c.bf16 %v1297_v16, %v1301_v13  ;;  %p1330_p1 = scmp.lt.s32.totalorder %s1328_s5, %s1322_s30 }
 0x34c   : > { %v885_v26 = vpack.c.bf16 %v1299_v35, %v1303_v52  ;;  %v1305_v54 = vpop.eup %1304 }
 0x34d   : > { %v1307_v25 = vpop.eup %1306  ;;  %p1331_p2 = por %p1330_p1, %p1329_p0 }
 0x34e   : > { %v1309_v59 = vpop.eup %1308 }
 0x34f   : > { %v1311_v61 = vpop.eup %1310  ;;  %v884_v43 = vpack.c.bf16 %v1305_v54, %v1309_v59  ;;  %p1332_p3 = pnand %p1331_p2, %p1325_p13 }
 0x350   : > { %v883_v50 = vpack.c.bf16 %v1307_v25, %v1311_v61  ;;  %v1313_v41 = vpop.eup %1312 }
 0x351   : > { %v1315_v15 = vpop.eup %1314 }
 0x352   : > { %927 = vmatpush2.bf16.xpose.msra.mxu1 %v888_v51  ;;  %v882_v62 = vpack.c.bf16 %v1313_v41, %v1315_v15 }
 0x353   : > { %928 = vmatprep.subr.bf16.mxu1 %v887_v42 }
 0x35a   : > { %929 = vmatpush2.bf16.xpose.msra.mxu1 %v886_v53 }
 0x35b   : > { %930 = vmatprep.subr.bf16.mxu1 %v885_v26 }
 0x362   : > { %931 = vmatpush2.bf16.xpose.msra.mxu1 %v884_v43 }
 0x363   : > { %932 = vmatprep.subr.bf16.mxu1 %v883_v50 }
 0x36a   : > { %933 = vmatpush2.bf16.xpose.msra.mxu1 %v882_v62 }
 0x371   : > { %935 = vmatmul.mubr.bf16.vlgmr.msra.gmra.mxu1 %v898_v11 }
 0x372   : > { %944 = vmatprep.mubr.bf16.mxu1 %v901_v36 }
 0x379   : > { %945 = vmatmul.mubr.bf16.gmra.mxu1 %v900_v22 }
 0x431   : > { %v936_v28 = vpop.f32.mrf.mxu1 }
 0x433   : > { %v938_v0 = vpop.f32.mrf.mxu1 }
 0x435   : > { %v940_v9 = vpop.f32.mrf.mxu1 }
 0x437   : > { %v942_v44 = vpop.f32.mrf.mxu1 }
 0x439   : > { %v946_v47 = vpop.f32.mrf.mxu1 }
 0x43a   : > { %1316 = vrcp.f32 %v946_v47 }
 0x43b   : > { %v948_v27 = vpop.f32.mrf.mxu1 }
 0x43c   : > { %1318 = vrcp.f32 %v948_v27 }
 0x43d   : > { %v950_v56 = vpop.f32.mrf.mxu1 }
 0x43f   : > { %v951_v32 = vpop.f32.mrf.mxu1 }
 0x447   : > { %v1317_v14 = vpop.eup %1316 }
 0x448   : > { %v958_v40 = vrot.slane %v1317_v14, %v957_v2 }
 0x449   : > { %v1319_v11 = vpop.eup %1318 }
 0x44a   : > { %v967_v17 = vmul.f32 %v958_v40, %v946_v47  ;;  %v962_v48 = vrot.slane %v1319_v11, %v957_v2  ;;  %v963_v1 = vmul.f32 %v958_v40, %v936_v28  ;;  %v965_v7 = vmul.f32 %v958_v40, %v940_v9 }
 0x44c   : > { %v968_v38 = vmul.f32 %v962_v48, %v948_v27  ;;  %v971_v49 = vpack.c.bf16 %v967_v17, %v967_v17  ;;  %v964_v6 = vmul.f32 %v962_v48, %v938_v0  ;;  %v966_v30 = vmul.f32 %v962_v48, %v942_v44 }
 0x44d   : > { %v969_v57 = vpack.c.bf16 %v965_v7, %v963_v1 }
 0x44e   : > { %v972_v18 = vpack.c.bf16 %v968_v38, %v968_v38  ;;  %v981_v19 = vand.u32 %v979_v31, %v971_v49  ;;  %v970_v33 = vpack.c.bf16 %v966_v30, %v964_v6 }
 0x450   : > { %v984_v46 = vand.u32 %v979_v31, %v972_v18 }
 0x452   : > { %998 = vmatprep.subr.bf16.mxu0 %v984_v46 }
 0x453   : > { %999 = vmatpush1.bf16.msra.mxu0 %v981_v19 }
 0x454   : > { %1000 = vmatprep.subr.bf16.mxu0 %v970_v33 }
 0x457   : > { %1001 = vmatpush1.bf16.msra.mxu0 %v969_v57 }
 0x45a   : > { %1135 = vmatmul.mubr.msk.bf16.vlgmr.msra.gmra.mxu0 %vm973_vm5, %v177_v21 }
 0x51a   : > { %v1020_v58 = vpop.f32.mrf.mxu0 }
 0x51b   : > { %v1027_v55 = vadd.f32 %v1320_v10, %v1020_v58 }
 0x51c   : > { %v1022_v29 = vpop.f32.mrf.mxu0 }
 0x51d   : > { %1029 = vst [vmem:[%s163_s24] sm:$0xff] %v1027_v55  ;;  %v1028_v63 = vadd.f32 %v1321_v45, %v1022_v29 }
 0x51e   : > { %v1024_v37 = vpop.f32.mrf.mxu0 }
 0x51f   : > { %1030 = vst [vmem:[%s163_s24 + $0x8] sm:$0xff] %v1028_v63 }
 0x520   : > { %v1025_v4 = vpop.f32.mrf.mxu0 }
 0x521   : > { %1335 = shalt.err (!%p1332_p3)
}
 0x522   : > { %s1336_s6 = scalar_lea.hbm %s1805_s29, 256  ;;  %s1340_s9 = scalar_lea.hbm %s1849_s3, 512 }
 0x523   : > { %p1337_p4 = scmp.ne.s32.totalorder %s1805_s29, %s1336_s6  ;;  %p1341_p9 = scmp.lt.s32.totalorder %s1805_s29, %s1849_s3 }
 0x524   : > { %p1342_p10 = scmp.lt.s32.totalorder %s1340_s9, %s1336_s6 }
 0x525   : > { %p1338_p7 = pnand %p1337_p4, %p1445_p5 }
 0x526   : > { %p1343_p11 = por %p1342_p10, %p1341_p9 }
 0x527   : > { %p1339_p8 = pneg %p1338_p7 }
 0x529   : > { %p1344_p12 = pnand %p1343_p11, %p1339_p8 }
 0x52b   : > { %1347 = shalt.err (!%p1344_p12)
}
 0x52c   : > { %1143 = dma.vmem_to_hbm [thread:$0]  (%p1445_p5), %s1807_s25, 256, %s1805_s29, %s1032_s16  }
 0x52d PF: > { %p1149_p13 = scmp.ge.s32.totalorder %s1382_s15, 2  ;;  %s1058_s17 = sand.u32 1, %s1370_s12  }
 0x52e   : > { %s1059_s19 = scalar_lea.sflag [#allocation3], %s1058_s17 }
 0x52f   : > { %p1146_p0 = pnand %p1149_p13, %p1449_p6 }
 0x531   : > { %p1147_p1 = pneg %p1146_p0 }
 0x533   : > { %1365 = dma.done.wait (%p1147_p1), %s1059_s19, 256  }
 0x534   : > { %1367 = vsyncadd (%p1147_p1), %s1059_s19, 4294967040  ;;  %p13_p2 = scmp.ge.s32.totalorder %s1432_s18, 4   ;;  %s1893_s12 = smov %s1374_s13 }
 0x535   : > { %s1894_s13 = smov %s1378_s14  ;;  %s1895_s14 = smov %s1443_s21 }
 0x536   : > { %s1896_s15 = smov %s1432_s18  ;;  %15 = sbr.rel (!%p13_p2) target bundleno = 3 (0x3), region = 67 }
 0x53b   :  { %1064 = vsyncpa [#allocation3], 1 }
 0x53c   :  { %1066 = vsyncpa [#allocation3 + $0x1], 1 }

</bundles_post_ra>
